<compile_context>
chip_gen: v5e
topology: v5e:2x2
jax: 0.10.0
libtpu: 0.0.40
codegen_flags: <defaults>
</compile_context>

<pallas_src>
import functools

import jax
import jax.numpy as jnp
from jax.experimental import pallas as pl
from jax.experimental.pallas import tpu as pltpu


def _oss_kernel(x_ref, off_ref, mult_ref, shift_ref, o_ref,
                *, quant_min, quant_max, use_floor):
    # x_ref:     (TM, TN) float32
    # off_ref:   (TM, 1)  float32   (broadcast along lanes)
    # mult_ref:  (TM, 1)  float32
    # shift_ref: (TM, 1)  float32
    # Two separate multiplies to match the reference rounding exactly.
    y = (x_ref[...] + off_ref[...]) * mult_ref[...]
    y = y * shift_ref[...]
    if use_floor:
        y = jnp.floor(y)
    else:
        y = jnp.round(y)            # half-to-even, same as torch.round
    o_ref[...] = jnp.clip(y, quant_min, quant_max).astype(o_ref.dtype)


def _choose_tiles(nc, hw, target_bytes=2 << 20):
    """Pick (tm, tn).

    tn: multiple of 128 (or the full extent when hw < 128) so inner stores are
        unmasked; never larger than the array's lane extent.
    tm: multiple of 8 (or the full extent nc).
    Block targets ~target_bytes of f32.  If the resulting grid would be a
    single program, split an axis so v7x megacore can shard the work.
    """
    if hw < 128:
        tn = hw                                   # full lane extent
    else:
        tn = min(2048, (hw // 128) * 128)         # 128-aligned, <= hw

    rows_for_target = max(8, target_bytes // (tn * 4))
    tm = min(nc, rows_for_target)
    if tm < nc:
        tm = max(8, (tm // 8) * 8)                # sublane-aligned rows

    grid_r = pl.cdiv(nc, tm)
    grid_c = pl.cdiv(hw, tn)
    if grid_r * grid_c == 1:
        # Prefer splitting the lane axis: the (tm,1) param blocks then keep
        # the same block index across consecutive steps (DMAs elided).
        if tn >= 256:
            tn = max(128, ((tn // 2) // 128) * 128)
        elif nc >= 16:
            tm = max(8, ((nc // 2) // 8) * 8)
        # else: tiny tensor; one program is fine (v5e/v6e no-op anyway).
    return tm, tn


def tinpu_offset_scale_shift(x, offset, mult, shift_mult,
                             quant_min, quant_max, use_floor=True,
                             out_dtype=jnp.float32):
    """x: (N, C, H, W) float32; offset/mult/shift_mult: (C,) float32.

    out_dtype defaults to float32 (matches the PyTorch module).  Passing
    jnp.int8 / jnp.bfloat16 is safe for int8-range quant bounds and reduces
    HBM writeback 4x / 2x.
    """
    N, C, H, W = x.shape
    NC, HW = N * C, H * W

    # Lane-dense 2D slab; NO padding — the grid overhangs ragged edges and
    # Pallas masks the edge stores.
    x2 = x.reshape(NC, HW)

    # Per-channel params replicated over the batch dim (O(N*C) work).
    off2 = jnp.tile(offset.astype(jnp.float32), (N,)).reshape(NC, 1)
    mult2 = jnp.tile(mult.astype(jnp.float32), (N,)).reshape(NC, 1)
    shift2 = jnp.tile(shift_mult.astype(jnp.float32), (N,)).reshape(NC, 1)

    tm, tn = _choose_tiles(NC, HW)
    grid = (pl.cdiv(NC, tm), pl.cdiv(HW, tn))

    kernel = functools.partial(
        _oss_kernel,
        quant_min=float(quant_min),
        quant_max=float(quant_max),
        use_floor=use_floor,
    )

    # Double-buffered footprint: x block + out block (+ tiny param blocks).
    out_elem_bytes = jnp.dtype(out_dtype).itemsize
    block_bytes_in = tm * tn * 4
    block_bytes_out = tm * tn * out_elem_bytes
    footprint = 2 * block_bytes_in + 2 * block_bytes_out + 6 * tm * 4
    # Explicit limit: above v5e's 16 MiB scoped default, well under v7x's
    # 64 MiB physical VMEM.
    vmem_limit = min(max(24 << 20, int(footprint * 2)), 48 << 20)

    cost = pl.CostEstimate(
        flops=4 * NC * HW,
        transcendentals=0,
        bytes_accessed=NC * HW * (4 + out_elem_bytes) + 3 * NC * 4,
    )

    out2 = pl.pallas_call(
        kernel,
        out_shape=jax.ShapeDtypeStruct((NC, HW), out_dtype),
        grid_spec=pltpu.PrefetchScalarGridSpec(
            num_scalar_prefetch=0,
            grid=grid,
            in_specs=[
                pl.BlockSpec((tm, tn), lambda i, j: (i, j)),
                pl.BlockSpec((tm, 1), lambda i, j: (i, 0)),
                pl.BlockSpec((tm, 1), lambda i, j: (i, 0)),
                pl.BlockSpec((tm, 1), lambda i, j: (i, 0)),
            ],
            out_specs=pl.BlockSpec((tm, tn), lambda i, j: (i, j)),
        ),
        compiler_params=pltpu.CompilerParams(
            dimension_semantics=("parallel", "parallel"),
            vmem_limit_bytes=vmem_limit,
        ),
        cost_estimate=cost,
    )(x2, off2, mult2, shift2)

    return out2.reshape(N, C, H, W)


def _reference(x, offset, mult, shift_mult, quant_min, quant_max, use_floor):
    off = offset.reshape(1, -1, 1, 1)
    m = mult.reshape(1, -1, 1, 1)
    s = shift_mult.reshape(1, -1, 1, 1)
    y = (x + off) * m
    y = y * s
    y = jnp.floor(y) if use_floor else jnp.round(y)
    return jnp.clip(y, quant_min, quant_max)


if __name__ == "__main__":
    key = jax.random.PRNGKey(0)
    kx, ko, km, ks = jax.random.split(key, 4)

    N, C, H, W = 2, 4, 16, 16
    quant_min, quant_max = -128.0, 127.0
    use_floor = True

    x = jax.random.normal(kx, (N, C, H, W), dtype=jnp.float32) * 50.0
    # Deterministic per-channel quantization params (synthetic, TINPU-style):
    offset = jnp.round(jax.random.uniform(ko, (C,), minval=-8.0, maxval=8.0))
    mult = jnp.round(jax.random.uniform(km, (C,), minval=1.0, maxval=16.0))
    shift = jax.random.randint(ks, (C,), 2, 6)
    shift_mult = (2.0 ** (-shift)).astype(jnp.float32)

    out = tinpu_offset_scale_shift(
        x, offset, mult, shift_mult, quant_min, quant_max, use_floor)
    out = jax.block_until_ready(out)

    ref = _reference(x, offset, mult, shift_mult, quant_min, quant_max,
                     use_floor)
    assert out.shape == (N, C, H, W)
    assert out.dtype == jnp.float32
    assert jnp.allclose(out, ref), "mismatch vs pure-JAX reference"

    print("KERNEL_OK")
</pallas_src>

<mosaic_0001>
module attributes {stable_mosaic.version = 11 : i64} {
  func.func @_oss_kernel(%arg0: i32, %arg1: i32, %arg2: memref<8x128xf32, #tpu.memory_space<vmem>>, %arg3: memref<8x1xf32, #tpu.memory_space<vmem>>, %arg4: memref<8x1xf32, #tpu.memory_space<vmem>>, %arg5: memref<8x1xf32, #tpu.memory_space<vmem>>, %arg6: memref<8x128xf32, #tpu.memory_space<vmem>>) attributes {dimension_semantics = [#tpu.dimension_semantics<parallel>, #tpu.dimension_semantics<parallel>], iteration_bounds = array<i64: 1, 2>, scalar_prefetch = 0 : i64, scratch_operands = 0 : i64, tpu.core_type = #tpu.core_type<tc>, window_params = [{transform_indices = @transform_0, window_bounds = array<i64: 8, 128>}, {transform_indices = @transform_1, window_bounds = array<i64: 8, 1>}, {transform_indices = @transform_2, window_bounds = array<i64: 8, 1>}, {transform_indices = @transform_3, window_bounds = array<i64: 8, 1>}, {transform_indices = @transform_4, window_bounds = array<i64: 8, 128>}]} {
    %c0 = arith.constant 0 : index
    %c0_0 = arith.constant 0 : index
    %0 = vector.load %arg2[%c0, %c0_0] : memref<8x128xf32, #tpu.memory_space<vmem>>, vector<8x128xf32>
    %c0_1 = arith.constant 0 : index
    %c0_2 = arith.constant 0 : index
    %1 = vector.load %arg3[%c0_1, %c0_2] : memref<8x1xf32, #tpu.memory_space<vmem>>, vector<8x1xf32>
    %2 = vector.broadcast %1 : vector<8x1xf32> to vector<8x128xf32>
    %3 = arith.addf %0, %2 : vector<8x128xf32>
    %c0_3 = arith.constant 0 : index
    %c0_4 = arith.constant 0 : index
    %4 = vector.load %arg4[%c0_3, %c0_4] : memref<8x1xf32, #tpu.memory_space<vmem>>, vector<8x1xf32>
    %5 = vector.broadcast %4 : vector<8x1xf32> to vector<8x128xf32>
    %6 = arith.mulf %3, %5 : vector<8x128xf32>
    %c0_5 = arith.constant 0 : index
    %c0_6 = arith.constant 0 : index
    %7 = vector.load %arg5[%c0_5, %c0_6] : memref<8x1xf32, #tpu.memory_space<vmem>>, vector<8x1xf32>
    %8 = vector.broadcast %7 : vector<8x1xf32> to vector<8x128xf32>
    %9 = arith.mulf %6, %8 : vector<8x128xf32>
    %10 = math.floor %9 : vector<8x128xf32>
    %cst = arith.constant -1.280000e+02 : f32
    %cst_7 = arith.constant 1.270000e+02 : f32
    %11 = vector.broadcast %cst : f32 to vector<8x128xf32>
    %12 = arith.maximumf %11, %10 : vector<8x128xf32>
    %13 = vector.broadcast %cst_7 : f32 to vector<8x128xf32>
    %14 = arith.minimumf %13, %12 : vector<8x128xf32>
    %c0_8 = arith.constant 0 : index
    %c0_9 = arith.constant 0 : index
    %15 = vector.load %arg6[%c0_8, %c0_9] : memref<8x128xf32, #tpu.memory_space<vmem>>, vector<8x128xf32>
    tpu.vector_store %arg6[%c0_8, %c0_9], %14 {strides = array<i32>} : memref<8x128xf32, #tpu.memory_space<vmem>>, vector<8x128xf32>,
    return
  }
  func.func @transform_0(%arg0: i32, %arg1: i32) -> (i32, i32) {
    %c0_i32 = arith.constant 0 : i32
    return %arg0, %arg1 : i32, i32
  }
  func.func @transform_1(%arg0: i32, %arg1: i32) -> (i32, i32) {
    %c0_i32 = arith.constant 0 : i32
    %c0_i32_0 = arith.constant 0 : i32
    return %arg0, %c0_i32 : i32, i32
  }
  func.func @transform_2(%arg0: i32, %arg1: i32) -> (i32, i32) {
    %c0_i32 = arith.constant 0 : i32
    %c0_i32_0 = arith.constant 0 : i32
    return %arg0, %c0_i32 : i32, i32
  }
  func.func @transform_3(%arg0: i32, %arg1: i32) -> (i32, i32) {
    %c0_i32 = arith.constant 0 : i32
    %c0_i32_0 = arith.constant 0 : i32
    return %arg0, %c0_i32 : i32, i32
  }
  func.func @transform_4(%arg0: i32, %arg1: i32) -> (i32, i32) {
    %c0_i32 = arith.constant 0 : i32
    return %arg0, %arg1 : i32, i32
  }
}

</mosaic_0001>

<bundles_post_ra>
// kernel: tpu_custom_call.1
= control target key start
LH: loop header
LB: loop body
LE: loop exit
PB: predicated region body
PF: predicated region fallthrough
CT: control target
= control target key end

     0   :  { %9 = vsyncpa [#allocation3], 0  ;;  %s720_s0 = inlined_call_operand.vmem [shape: f32[8,256], index: 0, kind: input, shape index: {}]   ;;  %s721_s1 = inlined_call_operand.vmem [shape: f32[8,1], index: 1, kind: input, shape index: {}]   ;;  %s722_s2 = inlined_call_operand.vmem [shape: f32[8,1], index: 2, kind: input, shape index: {}]   ;;  %s723_s3 = inlined_call_operand.vmem [shape: f32[8,1], index: 3, kind: input, shape index: {}]   ;;  %s724_s4 = inlined_call_operand.hbm [shape: f32[8,256], index: 4, kind: output, shape index: {}]  }
   0x1   :  { %11 = vsyncpa [#allocation3 + $0x1], 0  ;;  %s614_s15 = smov 0   ;;  %s616_s16 = smov 0  }
   0x2   :  { %s618_s17 = smov 0   ;;  %s620_s18 = smov 0  }
   0x3   :  { %s622_s19 = smov 0   ;;  %s624_s20 = smov 0  }
   0x4 LB: > { %s436_s21 = sadd.s32 4294967295, %s586_s20   ;;  %s437_s22 = sadd.s32 4294967294, %s586_s20   ;;  %s586_s20 = sphi %s624_s20, %s17_s20   ;;  %s582_s19 = sphi %s622_s19, %s731_s19   ;;  %s578_s18 = sphi %s620_s18, %s730_s18   ;;  %s574_s17 = sphi %s618_s17, %s729_s17   ;;  %s570_s16 = sphi %s616_s16, %s728_s16   ;;  %s566_s15 = sphi %s614_s15, %s727_s15  }
   0x5   : > { %s26_s23 = sadd.s32 1, %s582_s19  ;;  %s144_s24 = sadd.s32 1, %s574_s17 }
   0x6   : > { %p27_p0 = scmp.ge.s32.totalorder %s26_s23, 2  ;;  %p154_p1 = scmp.ne.s32.totalorder %s574_s17, %s570_s16 }
   0x7   : > { %p155_p2 = scmp.eq.s32.totalorder %s436_s21, 1  ;;  %p160_p3 = scmp.ne.s32.totalorder %s570_s16, %s566_s15 }
   0x8   : > { %s733_s23 = smov (%p27_p0, %s26_s23), 0  ;;  %p161_p5 = scmp.eq.s32.totalorder %s437_s22, 1 }
   0x9   : > { %p654_p4 = por %p155_p2, %p154_p1  ;;  %s140_s26 = ssub.s32 %s582_s19, %s733_s23 }
   0xa   : > { %p443_p6 = scmp.ge.s32.totalorder %s586_s20, 1  ;;  %p142_p7 = scmp.eq.s32.totalorder %s140_s26, 0 }
   0xb   : > { %p661_p8 = por %p161_p5, %p160_p3  ;;  %p211_p9 = scmp.lt.s32.totalorder %s586_s20, 3 }
   0xc   : > { %s667_s28 = scalar_select %p142_p7, %s574_s17, %s144_s24  }
   0xd   : > { %p212_p10 = pnand %p443_p6, %p211_p9 }
   0xe   : > { %p254_p11 = scmp.lt.s32.totalorder (!%p212_p10), %s578_s18, 1  ;;  %s249_s14 = sand.u32 (!%p212_p10), 1, %s570_s16  }
   0xf   : > { %215 = sbr.rel (%p212_p10) target bundleno = 158 (0x9e), region = 36  ;;  %s444_s21 = sshll.u32 (!%p212_p10), %s249_s14, 3 }
  0x10   : > { %s447_s22 = sshll.u32 (!%p212_p10), %s578_s18, 3  ;;  %s251_s30 = scalar_lea.vmem (!%p212_p10), [#allocation2], %s444_s21 }
  0x11   : > { %s311_s29 = scalar_lea.hbm (!%p212_p10), %s724_s4, %s447_s22  ;;  %s313_s5 = sshll.u32 (!%p212_p10), %s251_s30, 4  ;;  %s314_s5 = int_to_ptr.vmem [resolvable:$true] %s313_s5 }
  0x12   : > { %s315_s6 = sshll.u32 (!%p212_p10), %s311_s29, 4  ;;  %s299_s7 = scalar_lea.sflag (!%p212_p10), [#allocation3], %s249_s14  ;;  %s316_s6 = int_to_ptr.hbm [resolvable:$true] %s315_s6 }
  0x13   : > { %s522_s8 = sshra.s32 (!%p212_p10), %s316_s6, 4  ;;  %s528_s11 = scalar_lea.hbm (!%p212_p10), %s724_s4, 16  ;;  %s523_s8 = int_to_ptr.hbm [resolvable:$true] %s522_s8 }
  0x14   : > { %v273_v0 = vld [vmem:[%s721_s1] sm:$0xff]  ;;  %v588_v2 = vmov 0   ;;  %s255_s9 = scalar_select %p254_p11, %s578_s18, 1 }
  0x15   : > { %v287_v1 = vld [vmem:[%s723_s3] sm:$0xff]  ;;  %506 = vset.pattern.permute.xlu0 %v588_v2  ;;  %507 = vset.pattern.permute.xlu1 %v588_v2  ;;  %s524_s18 = scalar_lea.hbm %s523_s8, 8  ;;  %p529_p1 = scmp.lt.s32.totalorder %s523_s8, %s724_s4 }
  0x16   : > { %276 = vperm.xlu0 %506, %v273_v0   ;;  %290 = vperm.xlu1 %507, %v287_v1   ;;  %v280_v3 = vld [vmem:[%s722_s2] sm:$0xff]  ;;  %s445_s10 = sshll.u32 %s255_s9, 3  ;;  %p525_p12 = scmp.ne.s32.totalorder %s523_s8, %s524_s18 }
  0x17   : > { %s259_s13 = scalar_lea.vmem %s720_s0, %s445_s10  ;;  %p530_p2 = scmp.lt.s32.totalorder %s528_s11, %s524_s18 }
  0x18   : > { %v272_v5 = vld [vmem:[%s259_s13] sm:$0xff]  ;;  %p526_p13 = pnand %p525_p12, %p654_p4 }
  0x19   : > { %p531_p3 = por %p530_p2, %p529_p1 }
  0x1a   : > { %p527_p0 = pneg %p526_p13 }
  0x1c   : > { %p532_p5 = pnand %p531_p3, %p527_p0 }
  0x1e   : > { %283 = vperm.xlu0 %506, %v280_v3  }
  0x88   : > { %v277_v4 = vpop.permute.xlu0 %276  ;;  %v291_v8 = vpop.permute.xlu1 %290 }
  0x89   : > { %v279_v6 = vadd.f32 %v277_v4, %v272_v5 }
  0x90   : > { %v284_v7 = vpop.permute.xlu0 %283 }
  0x91   : > { %v286_v9 = vmul.f32 %v284_v7, %v279_v6 }
  0x93   : > { %v293_v10 = vmul.f32 %v291_v8, %v286_v9 }
  0x95   : > { %v294_v11 = vfloor.f32 %v293_v10 }
  0x97   : > { %v295_v12 = vmax.f32 %v294_v11, -128.0 }
  0x99   : > { %v296_v13 = vmin.f32 %v295_v12, 127.0 }
  0x9b   : > { %297 = vst [vmem:[%s251_s30] sm:$0xff] %v296_v13 }
  0x9c   : > { %535 = shalt.err (!%p532_p5)
}
  0x9d   : > { %450 = dma.vmem_to_hbm [thread:$0]  (%p654_p4), %s314_s5, 128, %s316_s6, %s299_s7  }
  0x9e PF: > { %p456_p6 = scmp.ge.s32.totalorder %s586_s20, 2  ;;  %s327_s14 = sand.u32 1, %s566_s15  }
  0x9f   : > { %s328_s21 = scalar_lea.sflag [#allocation3], %s327_s14 }
  0xa0   : > { %p453_p7 = pnand %p456_p6, %p661_p8 }
  0xa2   : > { %p454_p9 = pneg %p453_p7 }
  0xa4   : > { %561 = dma.done.wait (%p454_p9), %s328_s21, 128  }
  0xa5   : > { %563 = vsyncadd (%p454_p9), %s328_s21, 4294967168  ;;  %s17_s20 = sadd.s32 1, %s586_s20   ;;  %s727_s15 = smov %s570_s16 }
  0xa6   : > { %p14_p10 = scmp.ge.s32.totalorder %s17_s20, 4   ;;  %s728_s16 = smov %s574_s17 }
  0xa7   : > { %s729_s17 = smov %s667_s28  ;;  %s730_s18 = smov %s582_s19 }
  0xa8   : > { %s731_s19 = smov %s733_s23  ;;  %16 = sbr.rel (!%p14_p10) target bundleno = 4 (0x4), region = 80 }
  0xad   :  { %334 = vsyncpa [#allocation3], 1 }
  0xae   :  { %336 = vsyncpa [#allocation3 + $0x1], 1 }

</bundles_post_ra>
